<compile_context>
chip_gen: v7x
topology: tpu7x:2x2x1
jax: 0.10.0
libtpu: 0.0.40
codegen_flags: <defaults>
</compile_context>

<pallas_src>
import jax
import jax.numpy as jnp
from jax import lax
from jax.experimental import pallas as pl
from jax.experimental.pallas import tpu as pltpu

K = 3          # kernel (3, 3)
STRIDE = 2     # stride (2, 2)
PAD = 1        # padding (1, 1)
LEAKY = 0.2    # LeakyReLU negative slope
BN_EPS = 0.8   # nn.BatchNorm2d(hidden_size, 0.8) -> eps = 0.8


def _out_size(n):
    return (n + 2 * PAD - K) // STRIDE + 1


# ----------------------------------------------------------------------------
# The fused kernel: 3 conv blocks + out Linear, all VMEM-resident, grid-less.
# ----------------------------------------------------------------------------
def _fused_forward_kernel(a_ref, r0_ref, n0_ref, e0_ref,
                          r1_ref, n1_ref, e1_ref,
                          r2_ref, n2_ref, e2_ref,
                          lmat_ref, ob_ref, o_ref):
    def conv_block(a, r_ref, n_ref, e_ref, has_bn):
        # out = sum_kh (R_kh @ a) @ N_kh: vertical taps via the row gather,
        # horizontal taps / stride / padding / channel mix folded into N_kh.
        acc = jnp.dot(jnp.dot(r_ref[0], a, preferred_element_type=jnp.float32),
                      n_ref[0], preferred_element_type=jnp.float32)
        for kh in range(1, K):
            t = jnp.dot(r_ref[kh], a, preferred_element_type=jnp.float32)
            acc = acc + jnp.dot(t, n_ref[kh],
                                preferred_element_type=jnp.float32)
        e = e_ref[...]
        acc = acc + e[0:1, :]                              # conv bias
        acc = jnp.where(acc >= 0.0, acc, LEAKY * acc)      # LeakyReLU(0.2)
        # Dropout2d(0.25): identity in eval mode.
        if has_bn:
            acc = acc * e[1:2, :] + e[2:3, :]              # eval-mode BN
        return acc

    a = conv_block(a_ref[...], r0_ref, n0_ref, e0_ref, True)
    a = conv_block(a, r1_ref, n1_ref, e1_ref, True)
    a = conv_block(a, r2_ref, n2_ref, e2_ref, False)       # [B*H3, W3*C]

    # Out Linear: per-batch lane reduce + sublane reduce (no selector matmul,
    # no batch-tiled weight).
    lm = lmat_ref[...]                                     # [H3, W3*C]
    h3 = lm.shape[0]
    bsz = o_ref.shape[0]
    bias = ob_ref[...]                                     # [1, 1]
    for b in range(bsz):                                   # static unroll
        slab = a[b * h3:(b + 1) * h3, :]                   # static row slice
        s = jnp.sum(slab * lm, axis=1, keepdims=True)      # lane reduce
        s = jnp.sum(s, axis=0, keepdims=True)              # sublane reduce
        o_ref[b:b + 1, :] = (s + bias).astype(o_ref.dtype)


# ----------------------------------------------------------------------------
# Wrapper: one layout move in XLA, then a single pallas_call.
# ----------------------------------------------------------------------------
def single_window_disc_forward(x_nchw, kp):
    """x: [B, C, T, n_bins] (torch NCHW layout) -> validity logits [B, 1]."""
    B, C, T, Fq = x_nchw.shape
    # NCHW -> rows (b, h), lanes (w, c).  For C == 1 the transpose is free.
    a0 = jnp.transpose(x_nchw, (0, 2, 3, 1)).reshape(B * T, Fq * C)
    vmem = pl.BlockSpec(memory_space=pltpu.MemorySpace.VMEM)
    return pl.pallas_call(
        _fused_forward_kernel,
        out_shape=jax.ShapeDtypeStruct((B, 1), jnp.float32),
        in_specs=[vmem] * 12,
        out_specs=vmem,
    )(a0, kp["R0"], kp["N0"], kp["E0"],
      kp["R1"], kp["N1"], kp["E1"],
      kp["R2"], kp["N2"], kp["E2"],
      kp["Lmat"], kp["out_b"])


# ----------------------------------------------------------------------------
# Host-side (one-time) folding of conv weights into R_kh / N_kh matrices.
# ----------------------------------------------------------------------------
def _row_gather(batch, h_in, h_out, kh):
    """0/1 matrix selecting input row 2*h' + kh - 1 (zero row when padded)."""
    src = STRIDE * jnp.arange(h_out) + kh - PAD
    valid = (src >= 0) & (src < h_in)
    r = ((src[:, None] == jnp.arange(h_in)[None, :]) &
         valid[:, None]).astype(jnp.float32)                  # [h_out, h_in]
    return jnp.kron(jnp.eye(batch, dtype=jnp.float32), r)     # [B*ho, B*hi]


def _col_weight(w, kh, w_in, w_out):
    """Fold horizontal taps, stride, padding and channel mixing into a matrix.

    w: [Cout, Cin, K, K] (torch layout).  Returns [W_in*Cin, W_out*Cout] with
    N[(x, ci), (x', co)] = w[co, ci, kh, kw], kw = x - 2*x' + 1 if 0<=kw<K.
    """
    cout, cin = w.shape[0], w.shape[1]
    kw = jnp.arange(w_in)[:, None] - STRIDE * jnp.arange(w_out)[None, :] + PAD
    valid = (kw >= 0) & (kw < K)                               # [W_in, W_out]
    w_k = jnp.transpose(w[:, :, kh, :], (2, 1, 0))             # [K, Cin, Cout]
    blocks = w_k[jnp.clip(kw, 0, K - 1)]                       # [Wi,Wo,Ci,Co]
    blocks = blocks * valid[:, :, None, None]
    return jnp.transpose(blocks, (0, 2, 1, 3)).reshape(w_in * cin,
                                                       w_out * cout)


def prepare_kernel_params(tp, batch, c_in, hidden_size, time_length,
                          freq_length):
    """Torch-layout params -> kernel-ready folded matrices (one-time repack)."""
    kp = {}
    h_in, w_in, cin = time_length, freq_length, c_in
    for i in range(3):
        w = tp[f"conv{i}_w"]                                   # [Co, Ci, K, K]
        cout = w.shape[0]
        h_out, w_out = _out_size(h_in), _out_size(w_in)
        kp[f"R{i}"] = jnp.stack(
            [_row_gather(batch, h_in, h_out, kh) for kh in range(K)])
        kp[f"N{i}"] = jnp.stack(
            [_col_weight(w, kh, w_in, w_out) for kh in range(K)])
        bias_l = jnp.tile(tp[f"conv{i}_b"], w_out)             # lane (w', co)
        if i < 2:
            scale = tp[f"bn{i}_gamma"] * lax.rsqrt(tp[f"bn{i}_var"] + BN_EPS)
            shift = tp[f"bn{i}_beta"] - tp[f"bn{i}_mean"] * scale
            kp[f"E{i}"] = jnp.stack(
                [bias_l, jnp.tile(scale, w_out), jnp.tile(shift, w_out)])
        else:
            kp[f"E{i}"] = bias_l.reshape(1, w_out * cout)
        h_in, w_in, cin = h_out, w_out, cout
    h3, w3 = h_in, w_in
    # torch flattens NCHW (c, h, w); reorder out_w to Lmat[h, (w, c)].
    kp["Lmat"] = (tp["out_w"].reshape(hidden_size, h3, w3)
                  .transpose(1, 2, 0).reshape(h3, w3 * hidden_size))
    kp["out_b"] = tp["out_b"].reshape(1, 1)
    return kp


# ----------------------------------------------------------------------------
# Torch-layout parameter init (deterministic) + pure-JAX reference forward
# ----------------------------------------------------------------------------
def init_torch_params(key, time_length, freq_length, hidden_size, c_in):
    keys = jax.random.split(key, 20)
    p = {}
    cin = c_in
    k = 0
    for i in range(3):
        p[f"conv{i}_w"] = 0.1 * jax.random.normal(
            keys[k], (hidden_size, cin, K, K), jnp.float32); k += 1
        p[f"conv{i}_b"] = 0.1 * jax.random.normal(
            keys[k], (hidden_size,), jnp.float32); k += 1
        if i < 2:
            p[f"bn{i}_gamma"] = 1.0 + 0.1 * jax.random.normal(
                keys[k], (hidden_size,), jnp.float32); k += 1
            p[f"bn{i}_beta"] = 0.1 * jax.random.normal(
                keys[k], (hidden_size,), jnp.float32); k += 1
            p[f"bn{i}_mean"] = 0.05 * jax.random.normal(
                keys[k], (hidden_size,), jnp.float32); k += 1
            p[f"bn{i}_var"] = 1.0 + 0.1 * jax.random.uniform(
                keys[k], (hidden_size,), jnp.float32); k += 1
        cin = hidden_size
    # torch: ds_size = (time_length // 8, (freq_length + 7) // 8)
    ds0 = time_length // 2 ** 3
    ds1 = (freq_length + 7) // 2 ** 3
    in_features = hidden_size * ds0 * ds1
    p["out_w"] = 0.05 * jax.random.normal(
        keys[k], (1, in_features), jnp.float32); k += 1
    p["out_b"] = 0.01 * jax.random.normal(keys[k], (1,), jnp.float32)
    return p


def reference_forward(x_nchw, tp):
    """Eval-mode reference with XLA convs (for the correctness assert)."""
    h = x_nchw
    for i in range(3):
        h = lax.conv_general_dilated(
            h, tp[f"conv{i}_w"], window_strides=(STRIDE, STRIDE),
            padding=((PAD, PAD), (PAD, PAD)),
            dimension_numbers=("NCHW", "OIHW", "NCHW"))
        h = h + tp[f"conv{i}_b"][None, :, None, None]
        h = jnp.where(h >= 0.0, h, LEAKY * h)
        if i < 2:
            scale = tp[f"bn{i}_gamma"] / jnp.sqrt(tp[f"bn{i}_var"] + BN_EPS)
            shift = tp[f"bn{i}_beta"] - tp[f"bn{i}_mean"] * scale
            h = h * scale[None, :, None, None] + shift[None, :, None, None]
    flat = h.reshape(h.shape[0], -1)
    return flat @ tp["out_w"].T + tp["out_b"]


if __name__ == "__main__":
    key = jax.random.PRNGKey(0)
    kx, kparam = jax.random.split(key)

    # Small shapes: B=2, c_in=1, time_length=16, freq_length=16, hidden=32
    B, C_IN, T, NBINS, HIDDEN = 2, 1, 16, 16, 32
    x = jax.random.normal(kx, (B, C_IN, T, NBINS), jnp.float32)
    tparams = init_torch_params(kparam, time_length=T, freq_length=NBINS,
                                hidden_size=HIDDEN, c_in=C_IN)
    kparams = prepare_kernel_params(tparams, B, C_IN, HIDDEN, T, NBINS)

    fwd = jax.jit(single_window_disc_forward)
    out = jax.block_until_ready(fwd(x, kparams))

    assert out.shape == (B, 1), out.shape
    assert out.dtype == jnp.float32, out.dtype

    ref = reference_forward(x, tparams)
    assert jnp.allclose(out, ref, rtol=2e-2, atol=2e-2), (out, ref)
    print("KERNEL_OK")
</pallas_src>

<mosaic_0001>
module attributes {stable_mosaic.version = 11 : i64} {
  func.func @_fused_forward_kernel(%arg0: memref<32x16xf32, #tpu.memory_space<vmem>>, %arg1: memref<3x16x32xf32, #tpu.memory_space<vmem>>, %arg2: memref<3x16x256xf32, #tpu.memory_space<vmem>>, %arg3: memref<3x256xf32, #tpu.memory_space<vmem>>, %arg4: memref<3x8x16xf32, #tpu.memory_space<vmem>>, %arg5: memref<3x256x128xf32, #tpu.memory_space<vmem>>, %arg6: memref<3x128xf32, #tpu.memory_space<vmem>>, %arg7: memref<3x4x8xf32, #tpu.memory_space<vmem>>, %arg8: memref<3x128x64xf32, #tpu.memory_space<vmem>>, %arg9: memref<1x64xf32, #tpu.memory_space<vmem>>, %arg10: memref<2x64xf32, #tpu.memory_space<vmem>>, %arg11: memref<1x1xf32, #tpu.memory_space<vmem>>, %arg12: memref<2x1xf32, #tpu.memory_space<vmem>>) attributes {dimension_semantics = [], scalar_prefetch = 0 : i64, scratch_operands = 0 : i64, tpu.core_type = #tpu.core_type<tc>} {
    %c0 = arith.constant 0 : index
    %c0_0 = arith.constant 0 : index
    %0 = vector.load %arg0[%c0, %c0_0] : memref<32x16xf32, #tpu.memory_space<vmem>>, vector<32x16xf32>
    %c0_1 = arith.constant 0 : index
    %c0_2 = arith.constant 0 : index
    %c0_3 = arith.constant 0 : index
    %1 = vector.load %arg1[%c0_1, %c0_2, %c0_3] : memref<3x16x32xf32, #tpu.memory_space<vmem>>, vector<1x16x32xf32>
    %2 = vector.shape_cast %1 : vector<1x16x32xf32> to vector<16x32xf32>
    %cst = arith.constant dense<0.000000e+00> : vector<16x16xf32>
    %3 = tpu.matmul %2, %0, %cst {dimension_numbers = #tpu.dot_dimension_numbers<[1], [0], [0], [1], [0, 0, 1, 1], [], []>} : vector<16x32xf32>, vector<32x16xf32>, vector<16x16xf32> -> vector<16x16xf32>
    %c0_4 = arith.constant 0 : index
    %c0_5 = arith.constant 0 : index
    %c0_6 = arith.constant 0 : index
    %4 = vector.load %arg2[%c0_4, %c0_5, %c0_6] : memref<3x16x256xf32, #tpu.memory_space<vmem>>, vector<1x16x256xf32>
    %5 = vector.shape_cast %4 : vector<1x16x256xf32> to vector<16x256xf32>
    %cst_7 = arith.constant dense<0.000000e+00> : vector<16x256xf32>
    %6 = tpu.matmul %3, %5, %cst_7 {dimension_numbers = #tpu.dot_dimension_numbers<[1], [0], [0], [1], [0, 0, 1, 1], [], []>} : vector<16x16xf32>, vector<16x256xf32>, vector<16x256xf32> -> vector<16x256xf32>
    %c1 = arith.constant 1 : index
    %c0_8 = arith.constant 0 : index
    %c0_9 = arith.constant 0 : index
    %7 = vector.load %arg1[%c1, %c0_8, %c0_9] : memref<3x16x32xf32, #tpu.memory_space<vmem>>, vector<1x16x32xf32>
    %8 = vector.shape_cast %7 : vector<1x16x32xf32> to vector<16x32xf32>
    %cst_10 = arith.constant dense<0.000000e+00> : vector<16x16xf32>
    %9 = tpu.matmul %8, %0, %cst_10 {dimension_numbers = #tpu.dot_dimension_numbers<[1], [0], [0], [1], [0, 0, 1, 1], [], []>} : vector<16x32xf32>, vector<32x16xf32>, vector<16x16xf32> -> vector<16x16xf32>
    %c1_11 = arith.constant 1 : index
    %c0_12 = arith.constant 0 : index
    %c0_13 = arith.constant 0 : index
    %10 = vector.load %arg2[%c1_11, %c0_12, %c0_13] : memref<3x16x256xf32, #tpu.memory_space<vmem>>, vector<1x16x256xf32>
    %11 = vector.shape_cast %10 : vector<1x16x256xf32> to vector<16x256xf32>
    %cst_14 = arith.constant dense<0.000000e+00> : vector<16x256xf32>
    %12 = tpu.matmul %9, %11, %cst_14 {dimension_numbers = #tpu.dot_dimension_numbers<[1], [0], [0], [1], [0, 0, 1, 1], [], []>} : vector<16x16xf32>, vector<16x256xf32>, vector<16x256xf32> -> vector<16x256xf32>
    %13 = arith.addf %6, %12 : vector<16x256xf32>
    %c2 = arith.constant 2 : index
    %c0_15 = arith.constant 0 : index
    %c0_16 = arith.constant 0 : index
    %14 = vector.load %arg1[%c2, %c0_15, %c0_16] : memref<3x16x32xf32, #tpu.memory_space<vmem>>, vector<1x16x32xf32>
    %15 = vector.shape_cast %14 : vector<1x16x32xf32> to vector<16x32xf32>
    %cst_17 = arith.constant dense<0.000000e+00> : vector<16x16xf32>
    %16 = tpu.matmul %15, %0, %cst_17 {dimension_numbers = #tpu.dot_dimension_numbers<[1], [0], [0], [1], [0, 0, 1, 1], [], []>} : vector<16x32xf32>, vector<32x16xf32>, vector<16x16xf32> -> vector<16x16xf32>
    %c2_18 = arith.constant 2 : index
    %c0_19 = arith.constant 0 : index
    %c0_20 = arith.constant 0 : index
    %17 = vector.load %arg2[%c2_18, %c0_19, %c0_20] : memref<3x16x256xf32, #tpu.memory_space<vmem>>, vector<1x16x256xf32>
    %18 = vector.shape_cast %17 : vector<1x16x256xf32> to vector<16x256xf32>
    %cst_21 = arith.constant dense<0.000000e+00> : vector<16x256xf32>
    %19 = tpu.matmul %16, %18, %cst_21 {dimension_numbers = #tpu.dot_dimension_numbers<[1], [0], [0], [1], [0, 0, 1, 1], [], []>} : vector<16x16xf32>, vector<16x256xf32>, vector<16x256xf32> -> vector<16x256xf32>
    %20 = arith.addf %13, %19 : vector<16x256xf32>
    %c0_22 = arith.constant 0 : index
    %c0_23 = arith.constant 0 : index
    %21 = vector.load %arg3[%c0_22, %c0_23] : memref<3x256xf32, #tpu.memory_space<vmem>>, vector<3x256xf32>
    %22 = vector.extract_strided_slice %21 {offsets = [0, 0], sizes = [1, 256], strides = [1, 1]} : vector<3x256xf32> to vector<1x256xf32>
    %23 = vector.broadcast %22 : vector<1x256xf32> to vector<16x256xf32>
    %24 = arith.addf %20, %23 : vector<16x256xf32>
    %cst_24 = arith.constant 0.000000e+00 : f32
    %25 = vector.broadcast %cst_24 : f32 to vector<16x256xf32>
    %26 = arith.cmpf oge, %24, %25 : vector<16x256xf32>
    %cst_25 = arith.constant 2.000000e-01 : f32
    %27 = vector.broadcast %cst_25 : f32 to vector<16x256xf32>
    %28 = arith.mulf %27, %24 : vector<16x256xf32>
    %29 = arith.select %26, %24, %28 : vector<16x256xi1>, vector<16x256xf32>
    %30 = vector.extract_strided_slice %21 {offsets = [1, 0], sizes = [1, 256], strides = [1, 1]} : vector<3x256xf32> to vector<1x256xf32>
    %31 = vector.broadcast %30 : vector<1x256xf32> to vector<16x256xf32>
    %32 = arith.mulf %29, %31 : vector<16x256xf32>
    %33 = vector.extract_strided_slice %21 {offsets = [2, 0], sizes = [1, 256], strides = [1, 1]} : vector<3x256xf32> to vector<1x256xf32>
    %34 = vector.broadcast %33 : vector<1x256xf32> to vector<16x256xf32>
    %35 = arith.addf %32, %34 : vector<16x256xf32>
    %c0_26 = arith.constant 0 : index
    %c0_27 = arith.constant 0 : index
    %c0_28 = arith.constant 0 : index
    %36 = vector.load %arg4[%c0_26, %c0_27, %c0_28] : memref<3x8x16xf32, #tpu.memory_space<vmem>>, vector<1x8x16xf32>
    %37 = vector.shape_cast %36 : vector<1x8x16xf32> to vector<8x16xf32>
    %cst_29 = arith.constant dense<0.000000e+00> : vector<8x256xf32>
    %38 = tpu.matmul %37, %35, %cst_29 {dimension_numbers = #tpu.dot_dimension_numbers<[1], [0], [0], [1], [0, 0, 1, 1], [], []>} : vector<8x16xf32>, vector<16x256xf32>, vector<8x256xf32> -> vector<8x256xf32>
    %c0_30 = arith.constant 0 : index
    %c0_31 = arith.constant 0 : index
    %c0_32 = arith.constant 0 : index
    %39 = vector.load %arg5[%c0_30, %c0_31, %c0_32] : memref<3x256x128xf32, #tpu.memory_space<vmem>>, vector<1x256x128xf32>
    %40 = vector.shape_cast %39 : vector<1x256x128xf32> to vector<256x128xf32>
    %cst_33 = arith.constant dense<0.000000e+00> : vector<8x128xf32>
    %41 = tpu.matmul %38, %40, %cst_33 {dimension_numbers = #tpu.dot_dimension_numbers<[1], [0], [0], [1], [0, 0, 1, 1], [], []>} : vector<8x256xf32>, vector<256x128xf32>, vector<8x128xf32> -> vector<8x128xf32>
    %c1_34 = arith.constant 1 : index
    %c0_35 = arith.constant 0 : index
    %c0_36 = arith.constant 0 : index
    %42 = vector.load %arg4[%c1_34, %c0_35, %c0_36] : memref<3x8x16xf32, #tpu.memory_space<vmem>>, vector<1x8x16xf32>
    %43 = vector.shape_cast %42 : vector<1x8x16xf32> to vector<8x16xf32>
    %cst_37 = arith.constant dense<0.000000e+00> : vector<8x256xf32>
    %44 = tpu.matmul %43, %35, %cst_37 {dimension_numbers = #tpu.dot_dimension_numbers<[1], [0], [0], [1], [0, 0, 1, 1], [], []>} : vector<8x16xf32>, vector<16x256xf32>, vector<8x256xf32> -> vector<8x256xf32>
    %c1_38 = arith.constant 1 : index
    %c0_39 = arith.constant 0 : index
    %c0_40 = arith.constant 0 : index
    %45 = vector.load %arg5[%c1_38, %c0_39, %c0_40] : memref<3x256x128xf32, #tpu.memory_space<vmem>>, vector<1x256x128xf32>
    %46 = vector.shape_cast %45 : vector<1x256x128xf32> to vector<256x128xf32>
    %cst_41 = arith.constant dense<0.000000e+00> : vector<8x128xf32>
    %47 = tpu.matmul %44, %46, %cst_41 {dimension_numbers = #tpu.dot_dimension_numbers<[1], [0], [0], [1], [0, 0, 1, 1], [], []>} : vector<8x256xf32>, vector<256x128xf32>, vector<8x128xf32> -> vector<8x128xf32>
    %48 = arith.addf %41, %47 : vector<8x128xf32>
    %c2_42 = arith.constant 2 : index
    %c0_43 = arith.constant 0 : index
    %c0_44 = arith.constant 0 : index
    %49 = vector.load %arg4[%c2_42, %c0_43, %c0_44] : memref<3x8x16xf32, #tpu.memory_space<vmem>>, vector<1x8x16xf32>
    %50 = vector.shape_cast %49 : vector<1x8x16xf32> to vector<8x16xf32>
    %cst_45 = arith.constant dense<0.000000e+00> : vector<8x256xf32>
    %51 = tpu.matmul %50, %35, %cst_45 {dimension_numbers = #tpu.dot_dimension_numbers<[1], [0], [0], [1], [0, 0, 1, 1], [], []>} : vector<8x16xf32>, vector<16x256xf32>, vector<8x256xf32> -> vector<8x256xf32>
    %c2_46 = arith.constant 2 : index
    %c0_47 = arith.constant 0 : index
    %c0_48 = arith.constant 0 : index
    %52 = vector.load %arg5[%c2_46, %c0_47, %c0_48] : memref<3x256x128xf32, #tpu.memory_space<vmem>>, vector<1x256x128xf32>
    %53 = vector.shape_cast %52 : vector<1x256x128xf32> to vector<256x128xf32>
    %cst_49 = arith.constant dense<0.000000e+00> : vector<8x128xf32>
    %54 = tpu.matmul %51, %53, %cst_49 {dimension_numbers = #tpu.dot_dimension_numbers<[1], [0], [0], [1], [0, 0, 1, 1], [], []>} : vector<8x256xf32>, vector<256x128xf32>, vector<8x128xf32> -> vector<8x128xf32>
    %55 = arith.addf %48, %54 : vector<8x128xf32>
    %c0_50 = arith.constant 0 : index
    %c0_51 = arith.constant 0 : index
    %56 = vector.load %arg6[%c0_50, %c0_51] : memref<3x128xf32, #tpu.memory_space<vmem>>, vector<3x128xf32>
    %57 = vector.extract_strided_slice %56 {offsets = [0, 0], sizes = [1, 128], strides = [1, 1]} : vector<3x128xf32> to vector<1x128xf32>
    %58 = vector.broadcast %57 : vector<1x128xf32> to vector<8x128xf32>
    %59 = arith.addf %55, %58 : vector<8x128xf32>
    %cst_52 = arith.constant 0.000000e+00 : f32
    %60 = vector.broadcast %cst_52 : f32 to vector<8x128xf32>
    %61 = arith.cmpf oge, %59, %60 : vector<8x128xf32>
    %cst_53 = arith.constant 2.000000e-01 : f32
    %62 = vector.broadcast %cst_53 : f32 to vector<8x128xf32>
    %63 = arith.mulf %62, %59 : vector<8x128xf32>
    %64 = arith.select %61, %59, %63 : vector<8x128xi1>, vector<8x128xf32>
    %65 = vector.extract_strided_slice %56 {offsets = [1, 0], sizes = [1, 128], strides = [1, 1]} : vector<3x128xf32> to vector<1x128xf32>
    %66 = vector.broadcast %65 : vector<1x128xf32> to vector<8x128xf32>
    %67 = arith.mulf %64, %66 : vector<8x128xf32>
    %68 = vector.extract_strided_slice %56 {offsets = [2, 0], sizes = [1, 128], strides = [1, 1]} : vector<3x128xf32> to vector<1x128xf32>
    %69 = vector.broadcast %68 : vector<1x128xf32> to vector<8x128xf32>
    %70 = arith.addf %67, %69 : vector<8x128xf32>
    %c0_54 = arith.constant 0 : index
    %c0_55 = arith.constant 0 : index
    %c0_56 = arith.constant 0 : index
    %71 = vector.load %arg7[%c0_54, %c0_55, %c0_56] : memref<3x4x8xf32, #tpu.memory_space<vmem>>, vector<1x4x8xf32>
    %72 = vector.shape_cast %71 : vector<1x4x8xf32> to vector<4x8xf32>
    %cst_57 = arith.constant dense<0.000000e+00> : vector<4x128xf32>
    %73 = tpu.matmul %72, %70, %cst_57 {dimension_numbers = #tpu.dot_dimension_numbers<[1], [0], [0], [1], [0, 0, 1, 1], [], []>} : vector<4x8xf32>, vector<8x128xf32>, vector<4x128xf32> -> vector<4x128xf32>
    %c0_58 = arith.constant 0 : index
    %c0_59 = arith.constant 0 : index
    %c0_60 = arith.constant 0 : index
    %74 = vector.load %arg8[%c0_58, %c0_59, %c0_60] : memref<3x128x64xf32, #tpu.memory_space<vmem>>, vector<1x128x64xf32>
    %75 = vector.shape_cast %74 : vector<1x128x64xf32> to vector<128x64xf32>
    %cst_61 = arith.constant dense<0.000000e+00> : vector<4x64xf32>
    %76 = tpu.matmul %73, %75, %cst_61 {dimension_numbers = #tpu.dot_dimension_numbers<[1], [0], [0], [1], [0, 0, 1, 1], [], []>} : vector<4x128xf32>, vector<128x64xf32>, vector<4x64xf32> -> vector<4x64xf32>
    %c1_62 = arith.constant 1 : index
    %c0_63 = arith.constant 0 : index
    %c0_64 = arith.constant 0 : index
    %77 = vector.load %arg7[%c1_62, %c0_63, %c0_64] : memref<3x4x8xf32, #tpu.memory_space<vmem>>, vector<1x4x8xf32>
    %78 = vector.shape_cast %77 : vector<1x4x8xf32> to vector<4x8xf32>
    %cst_65 = arith.constant dense<0.000000e+00> : vector<4x128xf32>
    %79 = tpu.matmul %78, %70, %cst_65 {dimension_numbers = #tpu.dot_dimension_numbers<[1], [0], [0], [1], [0, 0, 1, 1], [], []>} : vector<4x8xf32>, vector<8x128xf32>, vector<4x128xf32> -> vector<4x128xf32>
    %c1_66 = arith.constant 1 : index
    %c0_67 = arith.constant 0 : index
    %c0_68 = arith.constant 0 : index
    %80 = vector.load %arg8[%c1_66, %c0_67, %c0_68] : memref<3x128x64xf32, #tpu.memory_space<vmem>>, vector<1x128x64xf32>
    %81 = vector.shape_cast %80 : vector<1x128x64xf32> to vector<128x64xf32>
    %cst_69 = arith.constant dense<0.000000e+00> : vector<4x64xf32>
    %82 = tpu.matmul %79, %81, %cst_69 {dimension_numbers = #tpu.dot_dimension_numbers<[1], [0], [0], [1], [0, 0, 1, 1], [], []>} : vector<4x128xf32>, vector<128x64xf32>, vector<4x64xf32> -> vector<4x64xf32>
    %83 = arith.addf %76, %82 : vector<4x64xf32>
    %c2_70 = arith.constant 2 : index
    %c0_71 = arith.constant 0 : index
    %c0_72 = arith.constant 0 : index
    %84 = vector.load %arg7[%c2_70, %c0_71, %c0_72] : memref<3x4x8xf32, #tpu.memory_space<vmem>>, vector<1x4x8xf32>
    %85 = vector.shape_cast %84 : vector<1x4x8xf32> to vector<4x8xf32>
    %cst_73 = arith.constant dense<0.000000e+00> : vector<4x128xf32>
    %86 = tpu.matmul %85, %70, %cst_73 {dimension_numbers = #tpu.dot_dimension_numbers<[1], [0], [0], [1], [0, 0, 1, 1], [], []>} : vector<4x8xf32>, vector<8x128xf32>, vector<4x128xf32> -> vector<4x128xf32>
    %c2_74 = arith.constant 2 : index
    %c0_75 = arith.constant 0 : index
    %c0_76 = arith.constant 0 : index
    %87 = vector.load %arg8[%c2_74, %c0_75, %c0_76] : memref<3x128x64xf32, #tpu.memory_space<vmem>>, vector<1x128x64xf32>
    %88 = vector.shape_cast %87 : vector<1x128x64xf32> to vector<128x64xf32>
    %cst_77 = arith.constant dense<0.000000e+00> : vector<4x64xf32>
    %89 = tpu.matmul %86, %88, %cst_77 {dimension_numbers = #tpu.dot_dimension_numbers<[1], [0], [0], [1], [0, 0, 1, 1], [], []>} : vector<4x128xf32>, vector<128x64xf32>, vector<4x64xf32> -> vector<4x64xf32>
    %90 = arith.addf %83, %89 : vector<4x64xf32>
    %c0_78 = arith.constant 0 : index
    %c0_79 = arith.constant 0 : index
    %91 = vector.load %arg9[%c0_78, %c0_79] : memref<1x64xf32, #tpu.memory_space<vmem>>, vector<1x64xf32>
    %92 = vector.broadcast %91 : vector<1x64xf32> to vector<4x64xf32>
    %93 = arith.addf %90, %92 : vector<4x64xf32>
    %cst_80 = arith.constant 0.000000e+00 : f32
    %94 = vector.broadcast %cst_80 : f32 to vector<4x64xf32>
    %95 = arith.cmpf oge, %93, %94 : vector<4x64xf32>
    %cst_81 = arith.constant 2.000000e-01 : f32
    %96 = vector.broadcast %cst_81 : f32 to vector<4x64xf32>
    %97 = arith.mulf %96, %93 : vector<4x64xf32>
    %98 = arith.select %95, %93, %97 : vector<4x64xi1>, vector<4x64xf32>
    %c0_82 = arith.constant 0 : index
    %c0_83 = arith.constant 0 : index
    %99 = vector.load %arg10[%c0_82, %c0_83] : memref<2x64xf32, #tpu.memory_space<vmem>>, vector<2x64xf32>
    %c0_84 = arith.constant 0 : index
    %c0_85 = arith.constant 0 : index
    %100 = vector.load %arg11[%c0_84, %c0_85] : memref<1x1xf32, #tpu.memory_space<vmem>>, vector<1x1xf32>
    %101 = vector.extract_strided_slice %98 {offsets = [0, 0], sizes = [2, 64], strides = [1, 1]} : vector<4x64xf32> to vector<2x64xf32>
    %102 = arith.mulf %101, %99 : vector<2x64xf32>
    %cst_86 = arith.constant dense<0.000000e+00> : vector<2xf32>
    %103 = vector.multi_reduction <add>, %102, %cst_86 [1] : vector<2x64xf32> to vector<2xf32>
    %104 = vector.shape_cast %103 : vector<2xf32> to vector<2x1xf32>
    %cst_87 = arith.constant dense<0.000000e+00> : vector<1xf32>
    %105 = vector.multi_reduction <add>, %104, %cst_87 [0] : vector<2x1xf32> to vector<1xf32>
    %106 = vector.shape_cast %105 : vector<1xf32> to vector<1x1xf32>
    %107 = arith.addf %106, %100 : vector<1x1xf32>
    %c0_88 = arith.constant 0 : index
    %c0_89 = arith.constant 0 : index
    %108 = vector.load %arg12[%c0_88, %c0_89] : memref<2x1xf32, #tpu.memory_space<vmem>>, vector<1x1xf32>
    tpu.vector_store %arg12[%c0_88, %c0_89], %107 {strides = array<i32>} : memref<2x1xf32, #tpu.memory_space<vmem>>, vector<1x1xf32>,
    %109 = vector.extract_strided_slice %98 {offsets = [2, 0], sizes = [2, 64], strides = [1, 1]} : vector<4x64xf32> to vector<2x64xf32>
    %110 = arith.mulf %109, %99 : vector<2x64xf32>
    %cst_90 = arith.constant dense<0.000000e+00> : vector<2xf32>
    %111 = vector.multi_reduction <add>, %110, %cst_90 [1] : vector<2x64xf32> to vector<2xf32>
    %112 = vector.shape_cast %111 : vector<2xf32> to vector<2x1xf32>
    %cst_91 = arith.constant dense<0.000000e+00> : vector<1xf32>
    %113 = vector.multi_reduction <add>, %112, %cst_91 [0] : vector<2x1xf32> to vector<1xf32>
    %114 = vector.shape_cast %113 : vector<1xf32> to vector<1x1xf32>
    %115 = arith.addf %114, %100 : vector<1x1xf32>
    %c1_92 = arith.constant 1 : index
    %c0_93 = arith.constant 0 : index
    %116 = vector.load %arg12[%c1_92, %c0_93] : memref<2x1xf32, #tpu.memory_space<vmem>>, vector<1x1xf32>
    tpu.vector_store %arg12[%c1_92, %c0_93], %115 {strides = array<i32>} : memref<2x1xf32, #tpu.memory_space<vmem>>, vector<1x1xf32>,
    return
  }
}

</mosaic_0001>

<bundles_post_ra>
// kernel: single_window_disc_forward.1
= control target key start
LH: loop header
LB: loop body
LE: loop exit
PB: predicated region body
PF: predicated region fallthrough
CT: control target
= control target key end

     0   :  { %s2836_s0 = inlined_call_operand.vmem [shape: f32[32,16], index: 0, kind: input, shape index: {}]   ;;  %s2837_s1 = inlined_call_operand.vmem [shape: f32[3,16,32], index: 1, kind: input, shape index: {}]   ;;  %s2838_s2 = inlined_call_operand.vmem [shape: f32[3,16,256], index: 2, kind: input, shape index: {}]   ;;  %s2839_s3 = inlined_call_operand.vmem [shape: f32[3,256], index: 3, kind: input, shape index: {}]   ;;  %s2840_s4 = inlined_call_operand.vmem [shape: f32[3,8,16], index: 4, kind: input, shape index: {}]   ;;  %s2841_s5 = inlined_call_operand.hbm [shape: f32[3,256,128], index: 5, kind: input, shape index: {}]   ;;  %s2842_s6 = inlined_call_operand.vmem [shape: f32[3,128], index: 6, kind: input, shape index: {}]   ;;  %s2843_s7 = inlined_call_operand.vmem [shape: f32[3,4,8], index: 7, kind: input, shape index: {}]   ;;  %s2844_s8 = inlined_call_operand.vmem [shape: f32[3,128,64], index: 8, kind: input, shape index: {}]   ;;  %s2845_s9 = inlined_call_operand.vmem [shape: f32[1,64], index: 9, kind: input, shape index: {}]   ;;  %s2846_s10 = inlined_call_operand.vmem [shape: f32[2,64], index: 10, kind: input, shape index: {}]   ;;  %s2847_s11 = inlined_call_operand.<no memory space> [shape: f32[1,1], index: 11, kind: input, shape index: {}]   ;;  %s2848_s12 = inlined_call_operand.vmem [shape: f32[2,1], index: 12, kind: output, shape index: {}]  }
   0x1   :  { %v17_v0 = vstv %s2847_s11 }
   0x2   :  { %18 = vst [vmem:[#allocation2] sm:$0x1] %v17_v0 }
   0x3   :  { %19 = vsyncpa [#allocation4], 0  ;;  %s2410_s23 = smov [#allocation3]   ;;  %s2386_s27 = scalar_lea.hbm %s2841_s5, 12288 }
   0x4   :  { %s35_s24 = sshll.u32 %s2410_s23, 4  ;;  %p2387_p0 = scmp.ne.s32.totalorder %s2841_s5, %s2386_s27  ;;  %s36_s24 = int_to_ptr.vmem [resolvable:$true] %s35_s24 }
   0x5   :  { %p2390_p1 = scmp.lt.u32.totalorder %s2386_s27, %s2841_s5 }
   0x7   :  { %p2392_p2 = pnand %p2390_p1, %p2387_p0 }
   0x9   :  { %2395 = shalt.err (!%p2392_p2)
}
   0xa   :  { %s2396_s11 = scalar_lea.vmem %s36_s24, 12288  ;;  %p2401_p4 = scmp.lt.s32.totalorder %s36_s24, %s36_s24 }
   0xb   :  { %p2397_p3 = scmp.ne.s32.totalorder %s36_s24, %s2396_s11  ;;  %p2402_p5 = scmp.lt.s32.totalorder %s2396_s11, %s2396_s11 }
   0xd   :  { %p2403_p6 = por %p2402_p5, %p2401_p4 }
   0xf   :  { %p2404_p7 = pnand %p2403_p6, %p2397_p3 }
  0x11   :  { %2407 = shalt.err (!%p2404_p7)
}
  0x12   :  { %s2411_s14 = smov 128   ;;  %s2412_s15 = smov 8  }
  0x13   :  { %41 = dma.hbm_to_vmem [thread:$0]  %s2841_s5, 12288, %s36_s24, [#allocation4], %s2411_s14, %s2411_s14, %s2412_s15  }
  0x14   :  { %2408 = dma.done.wait [#allocation4], 12288  }
  0x15   :  { %2409 = vsyncadd [#allocation4], 4294955008  ;;  %vm63_vm0 = vcmask 261120   ;;  %v57_v1 = vld [vmem:[%s2836_s0] sm:$0xff]  ;;  %v58_v2 = vld [vmem:[%s2836_s0 + $0x8] sm:$0xff]  ;;  %v2413_v17 = vmov 0.0  }
  0x16   :  { %v59_v3 = vld [vmem:[%s2836_s0 + $0x10] sm:$0xff]  ;;  %v2156_v4 = vpack.c.bf16 %v58_v2, %v57_v1  ;;  %v60_v5 = vld [vmem:[%s2836_s0 + $0x18] sm:$0xff]  ;;  %v1763_v8 = vld [vmem:[%s2838_s2 + $0x28] sm:$0xff]  ;;  %vm238_vm1 = vcmask 130048   ;;  %vm2414_vm6 = vmmov 0   ;;  %vm1217_vm8 = vcmask 64512  }
  0x17   :  { %v1758_v6 = vld [vmem:[%s2837_s1 + $0x10] sm:$0xff]  ;;  %v2160_v7 = vpack.c.bf16 %v60_v5, %v59_v3  ;;  %v61_v9 = vld [vmem:[%s2837_s1] sm:$0xff]  ;;  %v1765_v10 = vld [vmem:[%s2838_s2 + $0x38] sm:$0xff]  ;;  %vm1735_vm10 = vcmask 519170   ;;  %vm1716_vm11 = vcmask 517120   ;;  %vm1720_vm12 = vcmask 1041408  }
  0x18   :  { %2022 = vmatprep.mubr.msk.f32.mxu1 %vm63_vm0, %v1758_v6  ;;  %2165 = vmatprep.subr.bf16.mxu1 %v2156_v4  ;;  %v2172_v11 = vpack.c.bf16 %v1765_v10, %v1763_v8  ;;  %v1762_v12 = vld [vmem:[%s2838_s2 + $0x20] sm:$0xff]  ;;  %v1764_v13 = vld [vmem:[%s2838_s2 + $0x30] sm:$0xff]  ;;  %v1759_v14 = vld [vmem:[%s2837_s1 + $0x18] sm:$0xff]  ;;  %vm1729_vm13 = vcmask 0  }
  0x19   :  { %2157 = vmatprep.subr.bf16.mxu0 %v2156_v4  ;;  %2167 = vmatpush3.bf16.msra.mxu1 %v2156_v4  ;;  %v62_v15 = vld [vmem:[%s2837_s1 + $0x8] sm:$0xff]  ;;  %v2174_v16 = vpack.c.bf16 %v1764_v13, %v1762_v12  ;;  %v148_v19 = vld [vmem:[%s2838_s2 + $0x18] sm:$0xff]  ;;  %v145_v21 = vld [vmem:[%s2838_s2] sm:$0xff] }
  0x1a   :  { %2159 = vmatpush3.bf16.msra.mxu0 %v2156_v4  ;;  %2169 = vmatprep.subr.bf16.mxu1 %v2160_v7  ;;  %v146_v18 = vld [vmem:[%s2838_s2 + $0x8] sm:$0xff]  ;;  %v147_v22 = vld [vmem:[%s2838_s2 + $0x10] sm:$0xff]  ;;  %v1777_v29 = vld [vmem:[%s2838_s2 + $0x58] sm:$0xff] }
  0x1b   :  { %2161 = vmatprep.subr.bf16.mxu0 %v2160_v7  ;;  %2011 = vmatprep.mubr.msk.f32.mxu0 %vm63_vm0, %v61_v9  ;;  %v2176_v20 = vpack.c.bf16 %v148_v19, %v146_v18  ;;  %v2178_v23 = vpack.c.bf16 %v147_v22, %v145_v21  ;;  %v1775_v28 = vld [vmem:[%s2838_s2 + $0x48] sm:$0xff]  ;;  %v1770_v30 = vld [vmem:[%s2837_s1 + $0x20] sm:$0xff]  ;;  %v1776_v33 = vld [vmem:[%s2838_s2 + $0x50] sm:$0xff] }
  0x1c   :  { %v2188_v31 = vpack.c.bf16 %v1777_v29, %v1775_v28  ;;  %v1774_v32 = vld [vmem:[%s2838_s2 + $0x40] sm:$0xff]  ;;  %v1771_v34 = vld [vmem:[%s2837_s1 + $0x28] sm:$0xff]  ;;  %v754_v43 = vld [vmem:[#allocation3 + $0x90] sm:$0xff] }
  0x1d   :  { %2171 = vmatpush3.bf16.msra.mxu1 %v2160_v7  ;;  %v2190_v35 = vpack.c.bf16 %v1776_v33, %v1774_v32  ;;  %v752_v38 = vld [vmem:[#allocation3 + $0x80] sm:$0xff]  ;;  %v753_v39 = vld [vmem:[#allocation3 + $0x88] sm:$0xff]  ;;  %v755_v44 = vld [vmem:[#allocation3 + $0x98] sm:$0xff] }
  0x1e   :  { %2163 = vmatpush3.bf16.msra.mxu0 %v2160_v7  ;;  %v736_v40 = vld [vmem:[#allocation3] sm:$0xff]  ;;  %v2232_v41 = vpack.c.bf16 %v753_v39, %v752_v38  ;;  %v737_v42 = vld [vmem:[#allocation3 + $0x8] sm:$0xff]  ;;  %v2236_v46 = vpack.c.bf16 %v755_v44, %v754_v43  ;;  %v738_v47 = vld [vmem:[#allocation3 + $0x10] sm:$0xff] }
  0x1f   :  { %2173 = vmatprep.subr.bf16.mxu0 %v2172_v11  ;;  %v2234_v45 = vpack.c.bf16 %v737_v42, %v736_v40  ;;  %v739_v48 = vld [vmem:[#allocation3 + $0x18] sm:$0xff]  ;;  %v756_v49 = vld [vmem:[#allocation3 + $0xa0] sm:$0xff]  ;;  %v757_v50 = vld [vmem:[#allocation3 + $0xa8] sm:$0xff] }
  0x20   :  { %2023 = vmatmul.mubr.msk.f32.vlgmr.msra.gmra.mrb[0].mxu1 %vm63_vm0, %v1759_v14  ;;  %v2238_v51 = vpack.c.bf16 %v739_v48, %v738_v47  ;;  %v2240_v52 = vpack.c.bf16 %v757_v50, %v756_v49  ;;  %v740_v53 = vld [vmem:[#allocation3 + $0x20] sm:$0xff]  ;;  %v741_v54 = vld [vmem:[#allocation3 + $0x28] sm:$0xff]  ;;  %v758_v55 = vld [vmem:[#allocation3 + $0xb0] sm:$0xff] }
  0x21   :  { %2012 = vmatmul.mubr.msk.f32.vlgmr.msra.gmra.mrb[0].mxu0 %vm63_vm0, %v62_v15  ;;  %729 = vmatprep.mubr.f32.mxu1 %v2413_v17  ;;  %v759_v56 = vld [vmem:[#allocation3 + $0xb8] sm:$0xff]  ;;  %v2242_v57 = vpack.c.bf16 %v741_v54, %v740_v53  ;;  %v742_v59 = vld [vmem:[#allocation3 + $0x30] sm:$0xff]  ;;  %v760_v61 = vld [vmem:[#allocation3 + $0xc0] sm:$0xff] }
  0x22   :  { %2175 = vmatpush1.bf16.msra.mxu0 %v2174_v16  ;;  %309 = vmatprep.mubr.f32.mxu0 %v2413_v17  ;;  %v2244_v58 = vpack.c.bf16 %v759_v56, %v758_v55  ;;  %v743_v60 = vld [vmem:[#allocation3 + $0x38] sm:$0xff]  ;;  %v761_v62 = vld [vmem:[#allocation3 + $0xc8] sm:$0xff]  ;;  %v744_v1 = vld [vmem:[#allocation3 + $0x40] sm:$0xff] }
  0x23   :  { %2177 = vmatprep.subr.bf16.mxu0 %v2176_v20  ;;  %v2246_v63 = vpack.c.bf16 %v743_v60, %v742_v59  ;;  %v2248_v0 = vpack.c.bf16 %v761_v62, %v760_v61  ;;  %v745_v2 = vld [vmem:[#allocation3 + $0x48] sm:$0xff]  ;;  %v762_v3 = vld [vmem:[#allocation3 + $0xd0] sm:$0xff]  ;;  %v747_v8 = vld [vmem:[#allocation3 + $0x58] sm:$0xff]  ;;  %v583_v20 = vlaneseq }
  0x24   :  { %v2250_v5 = vpack.c.bf16 %v745_v2, %v744_v1  ;;  %v764_v9 = vld [vmem:[#allocation3 + $0xe0] sm:$0xff]  ;;  %v765_v10 = vld [vmem:[#allocation3 + $0xe8] sm:$0xff]  ;;  %v766_v15 = vld [vmem:[#allocation3 + $0xf0] sm:$0xff] }
  0x25   :  { %v2256_v12 = vpack.c.bf16 %v765_v10, %v764_v9  ;;  %v748_v13 = vld [vmem:[#allocation3 + $0x60] sm:$0xff]  ;;  %v749_v14 = vld [vmem:[#allocation3 + $0x68] sm:$0xff]  ;;  %v767_v16 = vld [vmem:[#allocation3 + $0xf8] sm:$0xff]  ;;  %v584_v21 = vshrl.u32 %v583_v20, 7 }
  0x26   :  { %v2258_v18 = vpack.c.bf16 %v749_v14, %v748_v13  ;;  %v2260_v19 = vpack.c.bf16 %v767_v16, %v766_v15  ;;  %v863_v9 = vld [vmem:[#allocation3 + $0x190] sm:$0xff]  ;;  %v864_v10 = vld [vmem:[#allocation3 + $0x198] sm:$0xff]  ;;  %v865_v16 = vld [vmem:[#allocation3 + $0x1a0] sm:$0xff] }
  0x27   :  { %v2581_v22 = vsub.s32 0, %v584_v21  ;;  %v623_v29 = vsub.s32 5, %v584_v21  ;;  %v2592_v33 = vsub.s32 2, %v584_v21  ;;  %v2204_v13 = vpack.c.bf16 %v864_v10, %v863_v9  ;;  %v847_v14 = vld [vmem:[#allocation3 + $0x110] sm:$0xff]  ;;  %v848_v15 = vld [vmem:[#allocation3 + $0x118] sm:$0xff] }
  0x28   :  { %v1096_v9 = vld [vmem:[#allocation3 + $0x210] sm:$0xff]  ;;  %v1097_v10 = vld [vmem:[#allocation3 + $0x218] sm:$0xff] }
  0xf3   :  { %v2024_v24 = vpop.f32.mrb[0].mxu1 }
  0xf4   :  { %v2013_v25 = vpop.f32.mrb[0].mxu0  ;;  %v224_v26 = vpop.f32.mrb[1].mxu1 }
  0xf5   :  { %v136_v27 = vpop.f32.mrb[1].mxu0  ;;  %1766 = vmatmul.mubr.msk.f32.vlgmr.msra.gmra.mrb[2].mxu0 %vm238_vm1, %v224_v26 }
  0xf6   :  { %315 = vmatprep.mubr.f32.mxu0 %v2413_v17  ;;  %2179 = vmatpush1.bf16.msra.mxu0 %v2178_v23  ;;  %v581_v23 = vld [vmem:[%s2839_s3] sm:$0x77] }
  0xf7   :  { %2181 = vmatprep.subr.bf16.mxu0 %v2156_v4 }
  0xf9   :  { %1767 = vmatmul.mubr.msk.f32.gmra.mrb[4].mxu0 %vm238_vm1, %v2024_v24  ;;  %v589_v24 = vsub.s32 4, %v584_v21 }
  0xfa   :  { %392 = vmatprep.mubr.f32.mxu0 %v2413_v17 }
  0xfb   :  { %v590_v26 = vrot.slane %v581_v23, %v589_v24  ;;  %v867_v24 = vld [vmem:[#allocation3 + $0x1b0] sm:$0xff] }
  0xfd   :  { %1768 = vmatmul.mubr.msk.f32.vlgmr.msra.gmra.mrb[2].mxu0 %vm238_vm1, %v136_v27  ;;  %v2587_v27 = vsub.s32 1, %v584_v21 }
  0xfe   :  { %2183 = vmatpush3.bf16.msra.mxu0 %v2156_v4  ;;  %398 = vmatprep.mubr.f32.mxu0 %v2413_v17  ;;  %v763_v4 = vld [vmem:[#allocation3 + $0xd8] sm:$0xff] }
  0xff   :  { %2185 = vmatprep.subr.bf16.mxu0 %v2160_v7  ;;  %v2252_v6 = vpack.c.bf16 %v763_v4, %v762_v3  ;;  %v620_v32 = vrot.slane %v581_v23, %v2587_v27  ;;  %v861_v3 = vld [vmem:[#allocation3 + $0x180] sm:$0xff]  ;;  %v862_v4 = vld [vmem:[#allocation3 + $0x188] sm:$0xff] }
 0x101   :  { %1769 = vmatmul.mubr.msk.f32.gmra.mrb[4].mxu0 %vm238_vm1, %v2013_v25  ;;  %v586_v25 = vrot.slane %v581_v23, %v2581_v22  ;;  %v630_v40 = vrot.slane %v620_v32, %v2587_v27  ;;  %v870_v32 = vld [vmem:[#allocation3 + $0x1c8] sm:$0xff] }
 0x102   :  { %2187 = vmatpush3.bf16.msra.mxu0 %v2160_v7  ;;  %2033 = vmatprep.mubr.msk.f32.mxu0 %vm63_vm0, %v1770_v30  ;;  %v746_v7 = vld [vmem:[#allocation3 + $0x50] sm:$0xff]  ;;  %v600_v30 = vrot.slane %v590_v26, %v2581_v22 }
 0x103   :  { %2189 = vmatprep.subr.bf16.mxu0 %v2188_v31  ;;  %v2254_v11 = vpack.c.bf16 %v747_v8, %v746_v7  ;;  %v596_v28 = vrot.slane %v586_v25, %v2581_v22  ;;  %v845_v7 = vld [vmem:[#allocation3 + $0x100] sm:$0xff]  ;;  %v846_v8 = vld [vmem:[#allocation3 + $0x108] sm:$0xff]  ;;  %v868_v25 = vld [vmem:[#allocation3 + $0x1b8] sm:$0xff] }
 0x105   :  { %2034 = vmatmul.mubr.msk.f32.vlgmr.msra.gmra.mrb[6].mxu0 %vm63_vm0, %v1771_v34 }
 0x106   :  { %2191 = vmatpush1.bf16.msra.mxu0 %v2190_v35  ;;  %564 = vmatprep.mubr.f32.mxu0 %v2413_v17 }
 0x107   :  { %2233 = vmatprep.subr.bf16.mxu0 %v2232_v41  ;;  %v642_v41 = vrot.slane %v581_v23, %v2592_v33 }
 0x109   :  { %v652_v53 = vrot.slane %v642_v41, %v2592_v33 }
 0x1d8   :  { %v2035_v36 = vpop.f32.mrb[6].mxu0 }
 0x1d9   :  { %v480_v37 = vpop.f32.mrb[7].mxu0 }
 0x1da   :  { %1778 = vmatmul.mubr.msk.f32.vlgmr.msra.gmra.mrb[2].mxu0 %vm238_vm1, %v480_v37  ;;  %v645_v37 = vsub.s32 6, %v584_v21  ;;  %v849_v21 = vld [vmem:[#allocation3 + $0x120] sm:$0xff] }
 0x1db   :  { %570 = vmatprep.mubr.f32.mxu0 %v2413_v17  ;;  %2235 = vmatpush3.bf16.msra.mxu0 %v2234_v45 }
 0x1dc   :  { %2237 = vmatprep.subr.bf16.mxu0 %v2236_v46  ;;  %v646_v48 = vrot.slane %v581_v23, %v645_v37  ;;  %v854_v37 = vld [vmem:[#allocation3 + $0x148] sm:$0xff] }
 0x1de   :  { %1779 = vmatmul.mubr.msk.f32.gmra.mrb[4].mxu0 %vm238_vm1, %v2035_v36  ;;  %v624_v36 = vrot.slane %v581_v23, %v623_v29  ;;  %v850_v23 = vld [vmem:[#allocation3 + $0x128] sm:$0xff]  ;;  %v851_v29 = vld [vmem:[#allocation3 + $0x130] sm:$0xff] }
 0x1df   :  { %2239 = vmatpush3.bf16.msra.mxu0 %v2238_v51  ;;  %v2210_v26 = vpack.c.bf16 %v850_v23, %v849_v21  ;;  %v1783_v21 = vld [vmem:[%s2840_s4 + $0x10] sm:$0xff] }
 0x1e0   :  { %2241 = vmatprep.subr.bf16.mxu0 %v2240_v52  ;;  %v634_v45 = vrot.slane %v624_v36, %v2587_v27  ;;  %v853_v36 = vld [vmem:[#allocation3 + $0x140] sm:$0xff] }
 0x1e3   :  { %2243 = vmatpush3.bf16.msra.mxu0 %v2242_v57  ;;  %v656_v57 = vrot.slane %v646_v48, %v2592_v33  ;;  %v857_v48 = vld [vmem:[#allocation3 + $0x160] sm:$0xff] }
 0x1e4   :  { %2245 = vmatprep.subr.bf16.mxu0 %v2244_v58 }
 0x1e7   :  { %2247 = vmatpush3.bf16.msra.mxu0 %v2246_v63 }
 0x1e8   :  { %2249 = vmatprep.subr.bf16.mxu0 %v2248_v0 }
 0x1eb   :  { %2251 = vmatpush3.bf16.msra.mxu0 %v2250_v5  ;;  %v661_v5 = vld [vmem:[%s2840_s4] sm:$0xff] }
 0x1ec   :  { %2253 = vmatprep.subr.bf16.mxu0 %v2252_v6  ;;  %v2200_v6 = vpack.c.bf16 %v862_v4, %v861_v3  ;;  %v1112_v3 = vld [vmem:[#allocation3 + $0x290] sm:$0xff]  ;;  %v1113_v4 = vld [vmem:[#allocation3 + $0x298] sm:$0xff] }
 0x1ef   :  { %2255 = vmatpush3.bf16.msra.mxu0 %v2254_v11  ;;  %v1781_v11 = vld [vmem:[%s2840_s4 + $0x8] sm:$0xff] }
 0x1f0   :  { %2257 = vmatprep.subr.bf16.mxu0 %v2256_v12  ;;  %v2202_v12 = vpack.c.bf16 %v846_v8, %v845_v7  ;;  %v2272_v8 = vpack.c.bf16 %v1113_v4, %v1112_v3  ;;  %v1293_v4 = vld [vmem:[%s2844_s8 + $0x10] sm:$0xff] }
 0x1f3   :  { %2259 = vmatpush3.bf16.msra.mxu0 %v2258_v18  ;;  %v866_v18 = vld [vmem:[#allocation3 + $0x1a8] sm:$0xff] }
 0x1f4   :  { %2261 = vmatprep.subr.bf16.mxu0 %v2260_v19  ;;  %v2206_v19 = vpack.c.bf16 %v848_v15, %v847_v14  ;;  %v2208_v20 = vpack.c.bf16 %v866_v18, %v865_v16  ;;  %v2274_v14 = vpack.c.bf16 %v1097_v10, %v1096_v9  ;;  %v1098_v16 = vld [vmem:[#allocation3 + $0x220] sm:$0xff]  ;;  %v1099_v18 = vld [vmem:[#allocation3 + $0x228] sm:$0xff] }
 0x1f5   :  { %v2278_v23 = vpack.c.bf16 %v1099_v18, %v1098_v16  ;;  %v1297_v10 = vld [vmem:[%s2844_s8 + $0x30] sm:$0xff]  ;;  %v1302_v16 = vld [vmem:[%s2844_s8 + $0x58] sm:$0xff] }
 0x2ad   :  { %v566_v31 = vpop.f32.mrb[2].mxu0 }
 0x2ae   :  { %v601_v34 = vadd.f32 %v596_v28, %v566_v31  ;;  %v568_v35 = vpop.f32.mrb[3].mxu0  ;;  %v869_v31 = vld [vmem:[#allocation3 + $0x1c0] sm:$0xff] }
 0x2af   :  { %v602_v38 = vadd.f32 %v600_v30, %v568_v35  ;;  %v2216_v35 = vpack.c.bf16 %v870_v32, %v869_v31  ;;  %v1102_v31 = vld [vmem:[#allocation3 + $0x240] sm:$0xff]  ;;  %v1103_v32 = vld [vmem:[#allocation3 + $0x248] sm:$0xff] }
 0x2b0   :  { %vm605_vm2 = vcmp.ge.f32.partialorder %v601_v34, 0.0  ;;  %v609_v39 = vmul.f32 0.2, %v601_v34 }
 0x2b1   :  { %vm606_vm3 = vcmp.ge.f32.partialorder %v602_v38, 0.0  ;;  %v610_v42 = vmul.f32 0.2, %v602_v38  ;;  %v572_v43 = vpop.f32.mrb[4].mxu0 }
 0x2b2   :  { %v613_v44 = vsel %vm605_vm2, %v601_v34, %v609_v39  ;;  %v603_v46 = vadd.f32 %v596_v28, %v572_v43  ;;  %v574_v47 = vpop.f32.mrb[5].mxu0  ;;  %v2212_v28 = vpack.c.bf16 %v868_v25, %v867_v24  ;;  %v872_v39 = vld [vmem:[#allocation3 + $0x1d8] sm:$0xff]  ;;  %v1100_v25 = vld [vmem:[#allocation3 + $0x230] sm:$0xff] }
 0x2b3   :  { %v614_v49 = vsel %vm606_vm3, %v602_v38, %v610_v42  ;;  %v604_v50 = vadd.f32 %v600_v30, %v574_v47  ;;  %v635_v52 = vmul.f32 %v630_v40, %v613_v44  ;;  %v852_v30 = vld [vmem:[#allocation3 + $0x138] sm:$0xff]  ;;  %v871_v38 = vld [vmem:[#allocation3 + $0x1d0] sm:$0xff]  ;;  %v873_v44 = vld [vmem:[#allocation3 + $0x1e0] sm:$0xff] }
 0x2b4   :  { %vm607_vm4 = vcmp.ge.f32.partialorder %v603_v46, 0.0  ;;  %v611_v51 = vmul.f32 0.2, %v603_v46  ;;  %v636_v55 = vmul.f32 %v634_v45, %v614_v49  ;;  %v2214_v34 = vpack.c.bf16 %v852_v30, %v851_v29  ;;  %v855_v42 = vld [vmem:[#allocation3 + $0x150] sm:$0xff]  ;;  %v856_v43 = vld [vmem:[#allocation3 + $0x158] sm:$0xff]  ;;  %v858_v49 = vld [vmem:[#allocation3 + $0x168] sm:$0xff] }
 0x2b5   :  { %vm608_vm5 = vcmp.ge.f32.partialorder %v604_v50, 0.0  ;;  %v612_v54 = vmul.f32 0.2, %v604_v50  ;;  %v657_v61 = vadd.f32 %v652_v53, %v635_v52  ;;  %v2220_v41 = vpack.c.bf16 %v872_v39, %v871_v38  ;;  %v1119_v29 = vld [vmem:[#allocation3 + $0x2c8] sm:$0xff]  ;;  %v1104_v38 = vld [vmem:[#allocation3 + $0x250] sm:$0xff]  ;;  %v1105_v39 = vld [vmem:[#allocation3 + $0x258] sm:$0xff] }
 0x2b6   :  { %v615_v56 = vsel %vm607_vm4, %v603_v46, %v611_v51  ;;  %v658_v63 = vadd.f32 %v656_v57, %v636_v55  ;;  %v2222_v46 = vpack.c.bf16 %v856_v43, %v855_v42  ;;  %v876_v51 = vld [vmem:[#allocation3 + $0x1f8] sm:$0xff]  ;;  %v2226_v52 = vpack.c.bf16 %v858_v49, %v857_v48  ;;  %v1123_v42 = vld [vmem:[#allocation3 + $0x2e8] sm:$0xff] }
 0x2b7   :  { %v637_v58 = vmul.f32 %v630_v40, %v615_v56  ;;  %v616_v59 = vsel %vm608_vm5, %v604_v50, %v612_v54  ;;  %v2218_v40 = vpack.c.bf16 %v854_v37, %v853_v36  ;;  %v875_v50 = vld [vmem:[#allocation3 + $0x1f0] sm:$0xff]  ;;  %v860_v55 = vld [vmem:[#allocation3 + $0x178] sm:$0xff]  ;;  %v2286_v36 = vpack.c.bf16 %v1103_v32, %v1102_v31 }
 0x2b8   :  { %v638_v60 = vmul.f32 %v634_v45, %v616_v59  ;;  %v874_v45 = vld [vmem:[#allocation3 + $0x1e8] sm:$0xff]  ;;  %v859_v54 = vld [vmem:[#allocation3 + $0x170] sm:$0xff]  ;;  %v1125_v48 = vld [vmem:[#allocation3 + $0x2f8] sm:$0xff] }
 0x2b9   :  { %v659_v62 = vadd.f32 %v652_v53, %v637_v58  ;;  %v2224_v47 = vpack.c.bf16 %v874_v45, %v873_v44  ;;  %v2228_v53 = vpack.c.bf16 %v876_v51, %v875_v50  ;;  %v2230_v56 = vpack.c.bf16 %v860_v55, %v859_v54  ;;  %v751_v58 = vld [vmem:[#allocation3 + $0x78] sm:$0xff]  ;;  %v1106_v44 = vld [vmem:[#allocation3 + $0x260] sm:$0xff]  ;;  %v1107_v45 = vld [vmem:[#allocation3 + $0x268] sm:$0xff] }
 0x2ba   :  { %v660_v0 = vadd.f32 %v656_v57, %v638_v60  ;;  %v750_v57 = vld [vmem:[#allocation3 + $0x70] sm:$0xff]  ;;  %v1110_v60 = vld [vmem:[#allocation3 + $0x280] sm:$0xff]  ;;  %v1109_v51 = vld [vmem:[#allocation3 + $0x278] sm:$0xff] }
 0x2bb   :  { %v2599_v1 = vpack.c.bf16 %v659_v62, %v657_v61  ;;  %v2262_v59 = vpack.c.bf16 %v751_v58, %v750_v57  ;;  %v1111_v61 = vld [vmem:[#allocation3 + $0x288] sm:$0xff]  ;;  %v1108_v50 = vld [vmem:[#allocation3 + $0x270] sm:$0xff] }
 0x2bc   :  { %v2601_v2 = vpack.c.bf16 %v660_v0, %v658_v63  ;;  %v2268_v62 = vpack.c.bf16 %v1111_v61, %v1110_v60  ;;  %v1094_v63 = vld [vmem:[#allocation3 + $0x200] sm:$0xff]  ;;  %v1095_v0 = vld [vmem:[#allocation3 + $0x208] sm:$0xff] }
 0x2bd   :  { %2263 = vmatpush3.bf16.msra.mxu0 %v2262_v59 }
 0x2be   :  { %2193 = vmatprep.subr.bf16.mxu1 %v2601_v2  ;;  %2269 = vmatprep.subr.bf16.mxu0 %v2268_v62  ;;  %v1291_v62 = vld [vmem:[%s2844_s8] sm:$0xff] }
 0x2bf   :  { %2195 = vmatpush1.bf16.msra.mxu1 %v2599_v1 }
 0x2c0   :  { %2197 = vmatprep.subr.bf16.mxu1 %v2601_v2 }
 0x2c2   :  { %1780 = vmatmul.mubr.msk.f32.vlgmr.msra.gmra.mrb[2].mxu1 %vm238_vm1, %v661_v5 }
 0x2c3   :  { %2199 = vmatpush1.bf16.msra.mxu1 %v2599_v1  ;;  %837 = vmatprep.mubr.f32.mxu1 %v2413_v17 }
 0x2c4   :  { %2201 = vmatprep.subr.bf16.mxu1 %v2200_v6  ;;  %v2270_v6 = vpack.c.bf16 %v1095_v0, %v1094_v63  ;;  %v1292_v63 = vld [vmem:[%s2844_s8 + $0x8] sm:$0xff]  ;;  %v2415_v0 = vmov 0.0|0.0  }
 0x2c5   :  { %v2325_v3 = vpack.c.bf16 %v1292_v63, %v1291_v62 }
 0x2c6   :  { %1782 = vmatmul.mubr.msk.f32.vlgmr.msra.gmra.mrb[4].mxu1 %vm238_vm1, %v1781_v11  ;;  %v1115_v11 = vld [vmem:[#allocation3 + $0x2a8] sm:$0xff] }
 0x2c7   :  { %2203 = vmatpush3.bf16.msra.mxu1 %v2202_v12 }
 0x2c8   :  { %2205 = vmatprep.subr.bf16.mxu1 %v2204_v13 }
 0x2cb   :  { %2207 = vmatpush3.bf16.msra.mxu1 %v2206_v19  ;;  %v1116_v19 = vld [vmem:[#allocation3 + $0x2b0] sm:$0xff] }
 0x2cc   :  { %2209 = vmatprep.subr.bf16.mxu1 %v2208_v20  ;;  %v1117_v20 = vld [vmem:[#allocation3 + $0x2b8] sm:$0xff] }
 0x2cd   :  { %v2280_v24 = vpack.c.bf16 %v1117_v20, %v1116_v19  ;;  %v1303_v19 = vld [vmem:[%s2844_s8 + $0x60] sm:$0xff]  ;;  %v1304_v20 = vld [vmem:[%s2844_s8 + $0x68] sm:$0xff] }
 0x2cf   :  { %2211 = vmatpush3.bf16.msra.mxu1 %v2210_v26  ;;  %v1101_v26 = vld [vmem:[#allocation3 + $0x238] sm:$0xff] }
 0x2d0   :  { %2213 = vmatprep.subr.bf16.mxu1 %v2212_v28  ;;  %v1118_v28 = vld [vmem:[#allocation3 + $0x2c0] sm:$0xff] }
 0x2d1   :  { %v2284_v30 = vpack.c.bf16 %v1119_v29, %v1118_v28 }
 0x2d3   :  { %2215 = vmatpush3.bf16.msra.mxu1 %v2214_v34  ;;  %v1120_v34 = vld [vmem:[#allocation3 + $0x2d0] sm:$0xff] }
 0x2d4   :  { %2217 = vmatprep.subr.bf16.mxu1 %v2216_v35  ;;  %v1121_v35 = vld [vmem:[#allocation3 + $0x2d8] sm:$0xff] }
 0x2d5   :  { %v2288_v37 = vpack.c.bf16 %v1121_v35, %v1120_v34 }
 0x2d7   :  { %2219 = vmatpush3.bf16.msra.mxu1 %v2218_v40  ;;  %v2290_v40 = vpack.c.bf16 %v1105_v39, %v1104_v38 }
 0x2d8   :  { %2221 = vmatprep.subr.bf16.mxu1 %v2220_v41  ;;  %v1122_v41 = vld [vmem:[#allocation3 + $0x2e0] sm:$0xff] }
 0x2d9   :  { %v2292_v43 = vpack.c.bf16 %v1123_v42, %v1122_v41  ;;  %v1790_v42 = vld [vmem:[%s2844_s8 + $0x90] sm:$0xff] }
 0x2db   :  { %2223 = vmatpush3.bf16.msra.mxu1 %v2222_v46  ;;  %v2294_v46 = vpack.c.bf16 %v1107_v45, %v1106_v44  ;;  %v1792_v45 = vld [vmem:[%s2844_s8 + $0xa0] sm:$0xff] }
 0x2dc   :  { %2225 = vmatprep.subr.bf16.mxu1 %v2224_v47  ;;  %v1124_v47 = vld [vmem:[#allocation3 + $0x2f0] sm:$0xff] }
 0x2dd   :  { %v2296_v49 = vpack.c.bf16 %v1125_v48, %v1124_v47  ;;  %v1794_v48 = vld [vmem:[%s2844_s8 + $0xb0] sm:$0xff] }
 0x2df   :  { %2227 = vmatpush3.bf16.msra.mxu1 %v2226_v52  ;;  %v2298_v52 = vpack.c.bf16 %v1109_v51, %v1108_v50  ;;  %v1796_v51 = vld [vmem:[%s2844_s8 + $0xc0] sm:$0xff] }
 0x2e0   :  { %2229 = vmatprep.subr.bf16.mxu1 %v2228_v53 }
 0x2e3   :  { %2231 = vmatpush3.bf16.msra.mxu1 %v2230_v56 }
 0x2e4   :  { %2265 = vmatprep.subr.bf16.mxu1 %v2601_v2  ;;  %v1114_v2 = vld [vmem:[#allocation3 + $0x2a0] sm:$0xff] }
 0x2e5   :  { %v2276_v15 = vpack.c.bf16 %v1115_v11, %v1114_v2  ;;  %v1298_v2 = vld [vmem:[%s2844_s8 + $0x38] sm:$0xff] }
 0x2e6   :  { %v2334_v11 = vpack.c.bf16 %v1298_v2, %v1297_v10  ;;  %v1808_v10 = vld [vmem:[%s2844_s8 + $0x110] sm:$0xff]  ;;  %v1809_v2 = vld [vmem:[%s2844_s8 + $0x118] sm:$0xff] }
 0x395   :  { %v731_v5 = vpop.f32.mrb[2].mxu1 }
 0x396   :  { %v733_v7 = vpop.f32.mrb[3].mxu1 }
 0x397   :  { %1011 = vmatprep.mubr.f32.mxu0 %v733_v7  ;;  %v1295_v7 = vld [vmem:[%s2844_s8 + $0x20] sm:$0xff] }
 0x398   :  { %1012 = vmatmul.mubr.f32.vlgmr.msra.gmra.mrb[8].mxu0 %v731_v5  ;;  %v1294_v5 = vld [vmem:[%s2844_s8 + $0x18] sm:$0xff] }
 0x399   :  { %v839_v12 = vpop.f32.mrb[4].mxu1  ;;  %2271 = vmatpush3.bf16.msra.mxu0 %v2270_v6  ;;  %v2328_v6 = vpack.c.bf16 %v1294_v5, %v1293_v4  ;;  %v1806_v4 = vld [vmem:[%s2844_s8 + $0x100] sm:$0xff]  ;;  %v1807_v5 = vld [vmem:[%s2844_s8 + $0x108] sm:$0xff] }
 0x39a   :  { %v841_v13 = vpop.f32.mrb[5].mxu1  ;;  %2273 = vmatprep.subr.bf16.mxu0 %v2272_v8  ;;  %v1296_v8 = vld [vmem:[%s2844_s8 + $0x28] sm:$0xff] }
 0x39b   :  { %941 = vmatprep.mubr.f32.mxu1 %v841_v13  ;;  %v2331_v9 = vpack.c.bf16 %v1296_v8, %v1295_v7  ;;  %v1300_v13 = vld [vmem:[%s2844_s8 + $0x48] sm:$0xff] }
 0x39c   :  { %942 = vmatmul.mubr.f32.vlgmr.msra.gmra.mrb[6].mxu1 %v839_v12  ;;  %v1299_v12 = vld [vmem:[%s2844_s8 + $0x40] sm:$0xff]  ;;  %v1804_v8 = vld [vmem:[%s2843_s7 + $0x8] sm:$0xf] }
 0x39d   :  { %2267 = vmatpush1.bf16.msra.mxu1 %v2599_v1  ;;  %1086 = vmatprep.mubr.f32.mxu1 %v2413_v17  ;;  %v2282_v1 = vpack.c.bf16 %v1101_v26, %v1100_v25  ;;  %v1197_v26 = vld [vmem:[%s2842_s6] sm:$0x7] }
 0x39e   :  { %2275 = vmatpush3.bf16.msra.mxu0 %v2274_v14  ;;  %2036 = vmatprep.subr.mxu1 %v2413_v17  ;;  %v2337_v14 = vpack.c.bf16 %v1300_v13, %v1299_v12  ;;  %v1209_v34 = vrot.slane %v1197_v26, %v2587_v27  ;;  %v1789_v27 = vld [vmem:[%s2844_s8 + $0x88] sm:$0xff]  ;;  %v1810_v12 = vld [vmem:[%s2844_s8 + $0x120] sm:$0xff] }
 0x39f   :  { %2277 = vmatprep.subr.bf16.mxu0 %v2276_v15  ;;  %v1301_v15 = vld [vmem:[%s2844_s8 + $0x50] sm:$0xff]  ;;  %v1811_v13 = vld [vmem:[%s2844_s8 + $0x128] sm:$0xff] }
 0x3a0   :  { %1784 = vmatmul.mubr.msk.f32.vlgmr.msra.gmra.mrb[8].mxu1 %vm238_vm1, %v1783_v21  ;;  %v2340_v18 = vpack.c.bf16 %v1302_v16, %v1301_v15  ;;  %v2343_v21 = vpack.c.bf16 %v1304_v20, %v1303_v19  ;;  %v1812_v15 = vld [vmem:[%s2844_s8 + $0x130] sm:$0xff]  ;;  %v1815_v19 = vld [vmem:[%s2844_s8 + $0x148] sm:$0xff] }
 0x3a1   :  { %2038 = vmatprep.mubr.msk.f32.mxu1 %vm2414_vm6, %v2413_v17 }
 0x3a2   :  { %2279 = vmatpush3.bf16.msra.mxu0 %v2278_v23  ;;  %v1305_v23 = vld [vmem:[%s2844_s8 + $0x70] sm:$0xff] }
 0x3a3   :  { %2281 = vmatprep.subr.bf16.mxu0 %v2280_v24  ;;  %v1306_v24 = vld [vmem:[%s2844_s8 + $0x78] sm:$0xff] }
 0x3a4   :  { %v2346_v25 = vpack.c.bf16 %v1306_v24, %v1305_v23  ;;  %v1817_v23 = vld [vmem:[%s2844_s8 + $0x158] sm:$0xff] }
 0x3a6   :  { %2283 = vmatpush3.bf16.msra.mxu0 %v2282_v1 }
 0x3a7   :  { %2285 = vmatprep.subr.bf16.mxu0 %v2284_v30  ;;  %v1201_v30 = vrot.slane %v1197_v26, %v2581_v22  ;;  %v1788_v22 = vld [vmem:[%s2844_s8 + $0x80] sm:$0xff] }
 0x3a8   :  { %v2301_v41 = vpack.c.bf16 %v1789_v27, %v1788_v22  ;;  %v1713_v27 = vld [vmem:[%s2846_s10] sm:$0x3] }
 0x3aa   :  { %2287 = vmatpush3.bf16.msra.mxu0 %v2286_v36  ;;  %v1214_v36 = vrot.slane %v1197_v26, %v2592_v33  ;;  %v1786_v33 = vld [vmem:[%s2843_s7 + $0x4] sm:$0xf]  ;;  %v1819_v26 = vld [vmem:[%s2844_s8 + $0x168] sm:$0xff] }
 0x3ab   :  { %2289 = vmatprep.subr.bf16.mxu0 %v2288_v37 }
 0x3ae   :  { %2291 = vmatpush3.bf16.msra.mxu0 %v2290_v40  ;;  %v1216_v40 = vld [vmem:[%s2843_s7] sm:$0xf] }
 0x3af   :  { %2293 = vmatprep.subr.bf16.mxu0 %v2292_v43  ;;  %v1791_v43 = vld [vmem:[%s2844_s8 + $0x98] sm:$0xff] }
 0x3b0   :  { %v2304_v44 = vpack.c.bf16 %v1791_v43, %v1790_v42 }
 0x3b2   :  { %2295 = vmatpush3.bf16.msra.mxu0 %v2294_v46  ;;  %v1793_v46 = vld [vmem:[%s2844_s8 + $0xa8] sm:$0xff] }
 0x3b3   :  { %2297 = vmatprep.subr.bf16.mxu0 %v2296_v49  ;;  %v2307_v47 = vpack.c.bf16 %v1793_v46, %v1792_v45  ;;  %v1795_v49 = vld [vmem:[%s2844_s8 + $0xb8] sm:$0xff] }
 0x3b4   :  { %v2310_v50 = vpack.c.bf16 %v1795_v49, %v1794_v48 }
 0x3b6   :  { %2299 = vmatpush3.bf16.msra.mxu0 %v2298_v52  ;;  %v1797_v52 = vld [vmem:[%s2844_s8 + $0xc8] sm:$0xff] }
 0x3b7   :  { %2324 = vmatprep.subr.bf16.mxu0 %v2415_v0 }
 0x46b   :  { %v1908_v53 = vpop.f32.mrb[8].mxu0 }
 0x46c   :  { %v1909_v54 = vpop.f32.mrb[9].mxu0 }
 0x46d   :  { %v1910_v55 = vadd.f32 %v1909_v54, %v1908_v53  ;;  %v2313_v53 = vpack.c.bf16 %v1797_v52, %v1796_v51  ;;  %v1798_v54 = vld [vmem:[%s2844_s8 + $0xd0] sm:$0xff] }
 0x46f   :  { %v1873_v56 = vpop.f32.mrb[6].mxu1 }
 0x470   :  { %v1874_v57 = vpop.f32.mrb[7].mxu1 }
 0x471   :  { %v1875_v58 = vadd.f32 %v1874_v57, %v1873_v56  ;;  %v1800_v57 = vld [vmem:[%s2844_s8 + $0xe0] sm:$0xff] }
 0x473   :  { %v1014_v59 = vadd.f32 %v1910_v55, %v1875_v58  ;;  %v1088_v60 = vpop.f32.mrb[8].mxu1  ;;  %v1799_v55 = vld [vmem:[%s2844_s8 + $0xd8] sm:$0xff]  ;;  %v1801_v58 = vld [vmem:[%s2844_s8 + $0xe8] sm:$0xff] }
 0x474   :  { %v1090_v61 = vpop.f32.mrb[9].mxu1  ;;  %v2316_v56 = vpack.c.bf16 %v1799_v55, %v1798_v54 }
 0x475   :  { %1190 = vmatprep.mubr.f32.mxu0 %v1090_v61  ;;  %v1803_v61 = vld [vmem:[%s2844_s8 + $0xf8] sm:$0xff] }
 0x476   :  { %1191 = vmatmul.mubr.f32.vlgmr.msra.gmra.mrb[10].mxu0 %v1088_v60  ;;  %v1802_v60 = vld [vmem:[%s2844_s8 + $0xf0] sm:$0xff] }
 0x477   :  { %2113 = vmatprep.mubr.msk.f32.mxu0 %vm2414_vm6, %v2413_v17  ;;  %2326 = vmatpush3.bf16.msra.mxu0 %v2325_v3  ;;  %v2322_v62 = vpack.c.bf16 %v1803_v61, %v1802_v60 }
 0x478   :  { %2327 = vmatprep.subr.bf16.mxu0 %v2415_v0 }
 0x47b   :  { %2329 = vmatpush3.bf16.msra.mxu0 %v2328_v6 }
 0x47c   :  { %2330 = vmatprep.subr.bf16.mxu0 %v2415_v0 }
 0x47f   :  { %2332 = vmatpush3.bf16.msra.mxu0 %v2331_v9  ;;  %v2349_v9 = vpack.c.bf16 %v1807_v5, %v1806_v4 }
 0x480   :  { %2333 = vmatprep.subr.bf16.mxu0 %v2415_v0 }
 0x483   :  { %2335 = vmatpush3.bf16.msra.mxu0 %v2334_v11  ;;  %v2352_v11 = vpack.c.bf16 %v1809_v2, %v1808_v10 }
 0x484   :  { %2336 = vmatprep.subr.bf16.mxu0 %v2415_v0 }
 0x487   :  { %2338 = vmatpush3.bf16.msra.mxu0 %v2337_v14  ;;  %v2355_v14 = vpack.c.bf16 %v1811_v13, %v1810_v12 }
 0x488   :  { %2339 = vmatprep.subr.bf16.mxu0 %v2415_v0 }
 0x48b   :  { %2341 = vmatpush3.bf16.msra.mxu0 %v2340_v18  ;;  %v1814_v18 = vld [vmem:[%s2844_s8 + $0x140] sm:$0xff] }
 0x48c   :  { %2342 = vmatprep.subr.bf16.mxu0 %v2415_v0  ;;  %v2361_v20 = vpack.c.bf16 %v1815_v19, %v1814_v18 }
 0x48f   :  { %2344 = vmatpush3.bf16.msra.mxu0 %v2343_v21  ;;  %v1816_v21 = vld [vmem:[%s2844_s8 + $0x150] sm:$0xff] }
 0x490   :  { %2345 = vmatprep.subr.bf16.mxu0 %v2415_v0  ;;  %v2364_v24 = vpack.c.bf16 %v1817_v23, %v1816_v21 }
 0x493   :  { %2347 = vmatpush3.bf16.msra.mxu0 %v2346_v25  ;;  %v1818_v25 = vld [vmem:[%s2844_s8 + $0x160] sm:$0xff] }
 0x549   :  { %v1943_v28 = vpop.f32.mrb[10].mxu0 }
 0x54a   :  { %v1944_v29 = vpop.f32.mrb[11].mxu0 }
 0x54b   :  { %v1945_v1 = vadd.f32 %v1944_v29, %v1943_v28  ;;  %v2367_v28 = vpack.c.bf16 %v1819_v26, %v1818_v25  ;;  %v1820_v29 = vld [vmem:[%s2844_s8 + $0x170] sm:$0xff] }
 0x54d   :  { %v1196_v31 = vadd.f32 %v1945_v1, %v1014_v59  ;;  %v2319_v59 = vpack.c.bf16 %v1801_v58, %v1800_v57  ;;  %v1821_v1 = vld [vmem:[%s2844_s8 + $0x178] sm:$0xff] }
 0x54f   :  { %v1202_v32 = vadd.f32 %v1201_v30, %v1196_v31  ;;  %v2370_v30 = vpack.c.bf16 %v1821_v1, %v1820_v29 }
 0x551   :  { %vm1203_vm7 = vcmp.ge.f32.partialorder %v1202_v32, 0.0  ;;  %v1204_v35 = vmul.f32 0.2, %v1202_v32 }
 0x553   :  { %v1205_v37 = vsel %vm1203_vm7, %v1202_v32, %v1204_v35 }
 0x554   :  { %v1210_v38 = vmul.f32 %v1209_v34, %v1205_v37 }
 0x556   :  { %v1215_v39 = vadd.f32 %v1214_v36, %v1210_v38 }
 0x558   :  { %2037 = vmatpush3.msra.mxu1 %v1215_v39 }
 0x559   :  { %2039 = vmatmul.mubr.msk.f32.vlgmr.msra.gmra.mrb[10].mxu1 %vm1217_vm8, %v1216_v40  ;;  %2041 = vmatprep.subr.mxu1 %v2413_v17 }
 0x55a   :  { %2042 = vmatpush3.msra.mxu1 %v1215_v39  ;;  %2043 = vmatprep.mubr.msk.f32.mxu1 %vm2414_vm6, %v2413_v17 }
 0x55b   :  { %2300 = vmatprep.subr.bf16.mxu1 %v2415_v0 }
 0x55d   :  { %2044 = vmatmul.mubr.msk.f32.vlgmr.msra.gmra.mrb[12].mxu1 %vm1217_vm8, %v1786_v33 }
 0x55e   :  { %2302 = vmatpush3.bf16.msra.mxu1 %v2301_v41  ;;  %2078 = vmatprep.mubr.msk.f32.mxu1 %vm2414_vm6, %v2413_v17  ;;  %v1732_v41 = vrot.slane %v1713_v27, 6 }
 0x55f   :  { %2303 = vmatprep.subr.bf16.mxu1 %v2415_v0 }
 0x562   :  { %2305 = vmatpush3.bf16.msra.mxu1 %v2304_v44 }
 0x563   :  { %2306 = vmatprep.subr.bf16.mxu1 %v2415_v0 }
 0x566   :  { %2308 = vmatpush3.bf16.msra.mxu1 %v2307_v47 }
 0x567   :  { %2309 = vmatprep.subr.bf16.mxu1 %v2415_v0 }
 0x56a   :  { %2311 = vmatpush3.bf16.msra.mxu1 %v2310_v50 }
 0x56b   :  { %2312 = vmatprep.subr.bf16.mxu1 %v2415_v0 }
 0x56e   :  { %2314 = vmatpush3.bf16.msra.mxu1 %v2313_v53 }
 0x56f   :  { %2315 = vmatprep.subr.bf16.mxu1 %v2415_v0 }
 0x572   :  { %2317 = vmatpush3.bf16.msra.mxu1 %v2316_v56 }
 0x573   :  { %2318 = vmatprep.subr.bf16.mxu1 %v2415_v0 }
 0x576   :  { %2320 = vmatpush3.bf16.msra.mxu1 %v2319_v59 }
 0x577   :  { %2321 = vmatprep.subr.bf16.mxu1 %v2415_v0 }
 0x57a   :  { %2323 = vmatpush3.bf16.msra.mxu1 %v2322_v62  ;;  %v1714_v62 = vld [vmem:[#allocation2] sm:$0x1] }
 0x57b   :  { %2116 = vmatprep.subr.mxu1 %v2413_v17 }
 0x62c   :  { %v1287_v63 = vpop.f32.mrb[10].mxu1 }
 0x62d   :  { %v2040_v3 = vpop.f32.mrb[11].mxu1  ;;  %2114 = vmatmul.mubr.f32.vlgmr.msra.gmra.mrb[12].mxu0 %v1287_v63 }
 0x630   :  { %v1378_v6 = vpop.f32.mrb[12].mxu1 }
 0x631   :  { %2079 = vmatmul.mubr.f32.vlgmr.msra.gmra.mrb[14].mxu1 %v1378_v6  ;;  %v2045_v7 = vpop.f32.mrb[13].mxu1 }
 0x632   :  { %2117 = vmatpush3.msra.mxu1 %v1215_v39  ;;  %2118 = vmatprep.mubr.msk.f32.mxu1 %vm2414_vm6, %v2413_v17 }
 0x633   :  { %2348 = vmatprep.subr.bf16.mxu1 %v2415_v0 }
 0x635   :  { %2119 = vmatmul.mubr.msk.f32.vlgmr.msra.gmra.mrb[16].mxu1 %vm1217_vm8, %v1804_v8 }
 0x636   :  { %2350 = vmatpush3.bf16.msra.mxu1 %v2349_v9  ;;  %2153 = vmatprep.mubr.msk.f32.mxu1 %vm2414_vm6, %v2413_v17  ;;  %v1813_v17 = vld [vmem:[%s2844_s8 + $0x138] sm:$0xff] }
 0x637   :  { %2351 = vmatprep.subr.bf16.mxu1 %v2415_v0  ;;  %v2358_v16 = vpack.c.bf16 %v1813_v17, %v1812_v15 }
 0x63a   :  { %2353 = vmatpush3.bf16.msra.mxu1 %v2352_v11 }
 0x63b   :  { %2354 = vmatprep.subr.bf16.mxu1 %v2415_v0 }
 0x63e   :  { %2356 = vmatpush3.bf16.msra.mxu1 %v2355_v14 }
 0x63f   :  { %2357 = vmatprep.subr.bf16.mxu1 %v2415_v0 }
 0x642   :  { %2359 = vmatpush3.bf16.msra.mxu1 %v2358_v16 }
 0x643   :  { %2360 = vmatprep.subr.bf16.mxu1 %v2415_v0 }
 0x646   :  { %2362 = vmatpush3.bf16.msra.mxu1 %v2361_v20 }
 0x647   :  { %2363 = vmatprep.subr.bf16.mxu1 %v2415_v0 }
 0x64a   :  { %2365 = vmatpush3.bf16.msra.mxu1 %v2364_v24 }
 0x64b   :  { %2366 = vmatprep.subr.bf16.mxu1 %v2415_v0 }
 0x64e   :  { %2368 = vmatpush3.bf16.msra.mxu1 %v2367_v28 }
 0x64f   :  { %2369 = vmatprep.subr.bf16.mxu1 %v2415_v0  ;;  %v1822_v0 = vld [vmem:[%s2845_s9] ss:$0 sm:$0xff] }
 0x652   :  { %2371 = vmatpush3.bf16.msra.mxu1 %v2370_v30 }
 0x700   :  { %v1535_v31 = vpop.f32.mrb[12].mxu0 }
 0x701   :  { %v2115_v32 = vpop.f32.mrb[13].mxu0 }
 0x704   :  { %v1465_v34 = vpop.f32.mrb[14].mxu1 }
 0x705   :  { %v1536_v35 = vadd.f32 %v1535_v31, %v1465_v34  ;;  %v2080_v36 = vpop.f32.mrb[15].mxu1 }
 0x708   :  { %v1610_v37 = vpop.f32.mrb[16].mxu1 }
 0x709   :  { %2154 = vmatmul.mubr.f32.vlgmr.msra.gmra.mrb[18].mxu1 %v1610_v37  ;;  %v2120_v38 = vpop.f32.mrb[17].mxu1 }
 0x7dc   :  { %v1697_v39 = vpop.f32.mrb[18].mxu1 }
 0x7dd   :  { %v1701_v40 = vadd.f32 %v1697_v39, %v1536_v35  ;;  %v2155_v22 = vpop.f32.mrb[19].mxu1 }
 0x7df   :  { %v1709_v33 = vadd.f32 %v1822_v0, %v1701_v40 }
 0x7e1   :  { %v1711_v42 = vmul.f32 0.2, %v1709_v33  ;;  %vm1710_vm9 = vcmp.ge.f32.partialorder %v1709_v33, 0.0 }
 0x7e3   :  { %v1712_v43 = vsel %vm1710_vm9, %v1709_v33, %v1711_v42 }
 0x7e4   :  { %v1734_v44 = vmul.f32 %v1732_v41, %v1712_v43  ;;  %v1715_v46 = vmul.f32 %v1713_v27, %v1712_v43 }
 0x7e6   :  { %v1736_v45 = vsel %vm1735_vm10, %v1734_v44, 0.0  ;;  %v1717_v47 = vsel %vm1716_vm11, %v1715_v46, 0.0 }
 0x7e7   :  { %1737 = vadd.xlane.f32.xlu0 %v1736_v45 }
 0x7eb   :  { %1718 = vadd.xlane.f32.xlu0 %v1717_v47 }
 0x874   :  { %v1738_v48 = vpop.xlane.xlu0 %1737 }
 0x875   :  { %v1740_v49 = vrot.slane %v1738_v48, 2 }
 0x877   :  { %v1742_v50 = vsel %vm1720_vm12, %v1740_v49, 0.0 }
 0x878   :  { %v1743_v51 = vrot.slane %v1742_v50, 4  ;;  %v1719_v52 = vpop.xlane.xlu0 %1718 }
 0x879   :  { %v1721_v53 = vsel %vm1720_vm12, %v1719_v52, 0.0 }
 0x87a   :  { %v1744_v54 = vadd.f32 %v1743_v51, %v1742_v50  ;;  %v1722_v55 = vrot.slane %v1721_v53, 4 }
 0x87c   :  { %v1745_v56 = vrot.slane %v1744_v54, 2  ;;  %v1723_v57 = vadd.f32 %v1722_v55, %v1721_v53 }
 0x87e   :  { %v1746_v58 = vadd.f32 %v1745_v56, %v1744_v54  ;;  %v1724_v59 = vrot.slane %v1723_v57, 2 }
 0x880   :  { %v1747_v60 = vrot.slane %v1746_v58, 1  ;;  %v1725_v61 = vadd.f32 %v1724_v59, %v1723_v57 }
 0x882   :  { %v1748_v63 = vadd.f32 %v1747_v60, %v1746_v58  ;;  %v1726_v3 = vrot.slane %v1725_v61, 1 }
 0x884   :  { %v1749_v4 = vadd.f32 %v1748_v63, %v1714_v62  ;;  %v1727_v5 = vadd.f32 %v1726_v3, %v1725_v61 }
 0x886   :  { %1750 = vst.msk [vmem:[%s2848_s12 + $0x1] sm:$0x1] %vm1729_vm13, %v1749_v4  ;;  %v1728_v6 = vadd.f32 %v1727_v5, %v1714_v62 }
 0x888   :  { %1730 = vst.msk [vmem:[%s2848_s12] sm:$0x1] %vm1729_vm13, %v1728_v6 }
 0x889   :  { %1755 = vsyncpa [#allocation4], 1 }

</bundles_post_ra>
